<compile_context>
chip_gen: v7x
topology: tpu7x:2x2x1
jax: 0.10.0
libtpu: 0.0.40
codegen_flags: <defaults>
</compile_context>

<pallas_src>
import functools

import jax
import jax.numpy as jnp
from jax.experimental import pallas as pl
from jax.experimental.pallas import tpu as pltpu


def _contrastive_loss_kernel(o1_ref, o2_ref, lab_ref, out_ref, *, margin, eps):
    # Load tile, cast to f32 for accumulation (no-op for f32 inputs).
    o1 = o1_ref[...].astype(jnp.float32)                      # (TB, D)
    o2 = o2_ref[...].astype(jnp.float32)                      # (TB, D)

    # torch.pairwise_distance: eps is added to the difference before the norm.
    diff = o1 - o2 + eps                                       # (TB, D)

    # Per-row squared L2 norm, relaid out lane-dense: (TB, D) -> (TB,) -> (1, TB).
    sq_sum = jnp.sum(diff * diff, axis=-1).reshape(1, -1)      # (1, TB)
    dist = jnp.sqrt(sq_sum)                                    # euclidean distance
    hinge = jnp.maximum(0.0, margin - dist)                    # max(0, margin - d)

    lab = lab_ref[...]                                         # (1, TB), f32

    # "Similar" term uses sq_sum directly (no dist*dist after sqrt).
    out_ref[...] = (1.0 - lab) * sq_sum * 0.5 + lab * (hinge * hinge) * 0.5


def _round_up(x, m):
    return -(-x // m) * m


def _choose_block_rows(B, D, itemsize, target_block_bytes=2 * 1024 * 1024,
                       max_rows=8192):
    """Row tile: ~2 MiB input blocks, multiple of 128, >=2 grid steps when possible."""
    row_align = 8 * max(1, 4 // max(itemsize, 1))   # 8 for f32, 16 for bf16, 32 for int8
    b_aligned = _round_up(B, row_align)
    if b_aligned <= 128:
        # Tiny batch: single exact-ish tile; lane width == full output dim.
        return b_aligned
    tb = target_block_bytes // max(D * itemsize, 1)
    tb = max(128, min(max_rows, (tb // 128) * 128))
    # Keep at least 2 grid steps so v7x's two TensorCores both stream data.
    tb = min(tb, _round_up(pl.cdiv(B, 2), 128))
    return tb


def contrastive_loss(output1, output2, label, margin=2.0, eps=1e-6, block_rows=None):
    """output1, output2: (B, D) float32/bf16; label: (B,) or (B,1). Returns (B,) f32."""
    B, D = output1.shape
    itemsize = jnp.dtype(output1.dtype).itemsize

    TB = int(block_rows) if block_rows is not None else _choose_block_rows(B, D, itemsize)
    TB = max(8, _round_up(TB, 8))
    if pl.cdiv(B, TB) > 1:
        # Multi-tile: output blocks are (1, TB) lanes, so TB must be a multiple of 128.
        TB = _round_up(TB, 128)
    num_tiles = pl.cdiv(B, TB)
    n_total = num_tiles * TB

    # Lane-dense label: one row, batch along lanes (tiny array, cheap to pad).
    lab_row = jnp.pad(label.astype(jnp.float32).reshape(-1), (0, n_total - B))
    lab_row = lab_row.reshape(1, n_total)

    kernel = functools.partial(
        _contrastive_loss_kernel, margin=float(margin), eps=float(eps)
    )

    cost = pl.CostEstimate(
        flops=int(3 * B * D + 10 * B),
        transcendentals=int(B),
        bytes_accessed=int(2 * B * D * itemsize + 8 * B),
    )

    out = pl.pallas_call(
        kernel,
        out_shape=jax.ShapeDtypeStruct((1, n_total), jnp.float32),
        grid=(num_tiles,),
        in_specs=[
            pl.BlockSpec((TB, D), lambda i: (i, 0)),     # output1 rows (last block ragged)
            pl.BlockSpec((TB, D), lambda i: (i, 0)),     # output2 rows
            pl.BlockSpec((1, TB), lambda i: (0, i)),     # label, lane-dense
        ],
        out_specs=pl.BlockSpec((1, TB), lambda i: (0, i)),  # loss, lane-dense
        compiler_params=pltpu.CompilerParams(
            dimension_semantics=("parallel",),
            vmem_limit_bytes=32 * 1024 * 1024,
        ),
        cost_estimate=cost,
    )(output1, output2, lab_row)

    return out.reshape(-1)[:B]


def _reference(output1, output2, label, margin=2.0, eps=1e-6):
    diff = output1.astype(jnp.float32) - output2.astype(jnp.float32) + eps
    d = jnp.sqrt(jnp.sum(diff * diff, axis=-1))
    hinge = jnp.maximum(0.0, margin - d)
    lab = label.astype(jnp.float32).reshape(-1)
    return (1.0 - lab) * d * d * 0.5 + lab * hinge * hinge * 0.5


if __name__ == "__main__":
    key = jax.random.PRNGKey(0)
    k1, k2, k3 = jax.random.split(key, 3)

    # Case 1: small batch of Siamese embedding pairs (single exact tile, D not mult of 128).
    B, D = 8, 64
    output1 = jax.random.normal(k1, (B, D), dtype=jnp.float32)
    output2 = jax.random.normal(k2, (B, D), dtype=jnp.float32)
    label = jax.random.bernoulli(k3, 0.5, (B,)).astype(jnp.float32)

    loss = jax.block_until_ready(contrastive_loss(output1, output2, label, margin=2.0))
    ref = _reference(output1, output2, label, margin=2.0)
    assert loss.shape == (B,)
    assert jnp.allclose(loss, ref, rtol=1e-5, atol=1e-5), (loss, ref)

    # Case 2: multi-tile + ragged last block (no input padding), lane-dense 128-wide output blocks.
    B2, D2 = 260, 128
    o1 = jax.random.normal(k1, (B2, D2), dtype=jnp.float32)
    o2 = jax.random.normal(k2, (B2, D2), dtype=jnp.float32)
    lab2 = jax.random.bernoulli(k3, 0.5, (B2,)).astype(jnp.float32)
    loss2 = jax.block_until_ready(
        contrastive_loss(o1, o2, lab2, margin=2.0, block_rows=128)
    )
    ref2 = _reference(o1, o2, lab2, margin=2.0)
    assert loss2.shape == (B2,)
    assert jnp.allclose(loss2, ref2, rtol=1e-5, atol=1e-4), (loss2, ref2)

    print("KERNEL_OK")
</pallas_src>

<mosaic_0001>
module attributes {stable_mosaic.version = 11 : i64} {
  func.func @_contrastive_loss_kernel(%arg0: i32, %arg1: memref<8x64xf32, #tpu.memory_space<vmem>>, %arg2: memref<8x64xf32, #tpu.memory_space<vmem>>, %arg3: memref<1x8xf32, #tpu.memory_space<vmem>>, %arg4: memref<1x8xf32, #tpu.memory_space<vmem>>) attributes {dimension_semantics = [#tpu.dimension_semantics<parallel>], iteration_bounds = array<i64: 1>, scalar_prefetch = 0 : i64, scratch_operands = 0 : i64, tpu.core_type = #tpu.core_type<tc>, window_params = [{transform_indices = @transform_0, window_bounds = array<i64: 8, 64>}, {transform_indices = @transform_1, window_bounds = array<i64: 8, 64>}, {transform_indices = @transform_2, window_bounds = array<i64: 1, 8>}, {transform_indices = @transform_3, window_bounds = array<i64: 1, 8>}]} {
    %c0 = arith.constant 0 : index
    %c0_0 = arith.constant 0 : index
    %0 = vector.load %arg1[%c0, %c0_0] : memref<8x64xf32, #tpu.memory_space<vmem>>, vector<8x64xf32>
    %c0_1 = arith.constant 0 : index
    %c0_2 = arith.constant 0 : index
    %1 = vector.load %arg2[%c0_1, %c0_2] : memref<8x64xf32, #tpu.memory_space<vmem>>, vector<8x64xf32>
    %2 = arith.subf %0, %1 : vector<8x64xf32>
    %cst = arith.constant 9.99999997E-7 : f32
    %3 = vector.broadcast %cst : f32 to vector<8x64xf32>
    %4 = arith.addf %2, %3 : vector<8x64xf32>
    %5 = arith.mulf %4, %4 : vector<8x64xf32>
    %cst_3 = arith.constant dense<0.000000e+00> : vector<8xf32>
    %6 = vector.multi_reduction <add>, %5, %cst_3 [1] : vector<8x64xf32> to vector<8xf32>
    %7 = vector.shape_cast %6 : vector<8xf32> to vector<1x8xf32>
    %8 = math.sqrt %7 : vector<1x8xf32>
    %cst_4 = arith.constant 2.000000e+00 : f32
    %9 = vector.broadcast %cst_4 : f32 to vector<1x8xf32>
    %10 = arith.subf %9, %8 : vector<1x8xf32>
    %cst_5 = arith.constant 0.000000e+00 : f32
    %11 = vector.broadcast %cst_5 : f32 to vector<1x8xf32>
    %12 = arith.maximumf %11, %10 : vector<1x8xf32>
    %c0_6 = arith.constant 0 : index
    %c0_7 = arith.constant 0 : index
    %13 = vector.load %arg3[%c0_6, %c0_7] : memref<1x8xf32, #tpu.memory_space<vmem>>, vector<1x8xf32>
    %cst_8 = arith.constant 1.000000e+00 : f32
    %14 = vector.broadcast %cst_8 : f32 to vector<1x8xf32>
    %15 = arith.subf %14, %13 : vector<1x8xf32>
    %16 = arith.mulf %15, %7 : vector<1x8xf32>
    %cst_9 = arith.constant 5.000000e-01 : f32
    %17 = vector.broadcast %cst_9 : f32 to vector<1x8xf32>
    %18 = arith.mulf %16, %17 : vector<1x8xf32>
    %19 = arith.mulf %12, %12 : vector<1x8xf32>
    %20 = arith.mulf %13, %19 : vector<1x8xf32>
    %cst_10 = arith.constant 5.000000e-01 : f32
    %21 = vector.broadcast %cst_10 : f32 to vector<1x8xf32>
    %22 = arith.mulf %20, %21 : vector<1x8xf32>
    %23 = arith.addf %18, %22 : vector<1x8xf32>
    %c0_11 = arith.constant 0 : index
    %c0_12 = arith.constant 0 : index
    %24 = vector.load %arg4[%c0_11, %c0_12] : memref<1x8xf32, #tpu.memory_space<vmem>>, vector<1x8xf32>
    tpu.vector_store %arg4[%c0_11, %c0_12], %23 {strides = array<i32>} : memref<1x8xf32, #tpu.memory_space<vmem>>, vector<1x8xf32>,
    return
  }
  func.func @transform_0(%arg0: i32) -> (i32, i32) {
    %c0_i32 = arith.constant 0 : i32
    %c0_i32_0 = arith.constant 0 : i32
    return %arg0, %c0_i32 : i32, i32
  }
  func.func @transform_1(%arg0: i32) -> (i32, i32) {
    %c0_i32 = arith.constant 0 : i32
    %c0_i32_0 = arith.constant 0 : i32
    return %arg0, %c0_i32 : i32, i32
  }
  func.func @transform_2(%arg0: i32) -> (i32, i32) {
    %c0_i32 = arith.constant 0 : i32
    %c0_i32_0 = arith.constant 0 : i32
    return %c0_i32, %arg0 : i32, i32
  }
  func.func @transform_3(%arg0: i32) -> (i32, i32) {
    %c0_i32 = arith.constant 0 : i32
    %c0_i32_0 = arith.constant 0 : i32
    return %c0_i32, %arg0 : i32, i32
  }
}

</mosaic_0001>

<bundles_post_ra>
// kernel: tpu_custom_call.1
= control target key start
LH: loop header
LB: loop body
LE: loop exit
PB: predicated region body
PF: predicated region fallthrough
CT: control target
= control target key end

     0   :  { %8 = vsyncpa [#allocation3], 0  ;;  %s460_s0 = inlined_call_operand.hbm [shape: f32[8,64], index: 0, kind: input, shape index: {}]   ;;  %s461_s1 = inlined_call_operand.hbm [shape: f32[8,64], index: 1, kind: input, shape index: {}]   ;;  %s462_s2 = inlined_call_operand.vmem [shape: f32[1,8], index: 2, kind: input, shape index: {}]   ;;  %s463_s3 = inlined_call_operand.hbm [shape: f32[1,8], index: 3, kind: output, shape index: {}]  }
   0x1   :  { %9 = vsyncpa [#allocation6], 0 }
   0x2   :  { %10 = vsyncpa [#allocation4], 0  ;;  %s374_s12 = smov [#allocation2]   ;;  %s375_s14 = smov [#allocation5]  }
   0x3   :  { %s17_s13 = sshll.u32 %s374_s12, 4  ;;  %s27_s15 = sshll.u32 %s375_s14, 4  ;;  %s18_s13 = int_to_ptr.vmem [resolvable:$true] %s17_s13  ;;  %s28_s15 = int_to_ptr.vmem [resolvable:$true] %s27_s15 }
   0x4   :  { %s302_s18 = scalar_lea.hbm %s460_s0, 128 }
   0x5   :  { %p303_p0 = scmp.ne.s32.totalorder %s460_s0, %s302_s18  ;;  %p306_p1 = scmp.lt.u32.totalorder %s302_s18, %s460_s0 }
   0x7   :  { %p308_p2 = pnand %p306_p1, %p303_p0 }
   0x9   :  { %311 = shalt.err (!%p308_p2)
}
   0xa   :  { %s312_s23 = scalar_lea.vmem %s18_s13, 128  ;;  %p317_p4 = scmp.lt.s32.totalorder %s18_s13, %s18_s13 }
   0xb   :  { %p313_p3 = scmp.ne.s32.totalorder %s18_s13, %s312_s23  ;;  %p318_p5 = scmp.lt.s32.totalorder %s312_s23, %s312_s23 }
   0xd   :  { %p319_p6 = por %p318_p5, %p317_p4 }
   0xf   :  { %p320_p7 = pnand %p319_p6, %p313_p3 }
  0x11   :  { %323 = shalt.err (!%p320_p7)
}
  0x12   :  { %20 = dma.hbm_to_vmem [thread:$0]  %s460_s0, 128, %s18_s13, [#allocation3]  }
  0x13   :  { %s324_s28 = scalar_lea.hbm %s461_s1, 128 }
  0x14   :  { %p325_p8 = scmp.ne.s32.totalorder %s461_s1, %s324_s28  ;;  %p328_p9 = scmp.lt.u32.totalorder %s324_s28, %s461_s1 }
  0x16   :  { %p330_p10 = pnand %p328_p9, %p325_p8 }
  0x18   :  { %333 = shalt.err (!%p330_p10)
}
  0x19   :  { %s334_s6 = scalar_lea.vmem %s28_s15, 128  ;;  %p339_p12 = scmp.lt.s32.totalorder %s28_s15, %s28_s15 }
  0x1a   :  { %p335_p11 = scmp.ne.s32.totalorder %s28_s15, %s334_s6  ;;  %p340_p13 = scmp.lt.s32.totalorder %s334_s6, %s334_s6 }
  0x1c   :  { %p341_p0 = por %p340_p13, %p339_p12 }
  0x1e   :  { %p342_p1 = pnand %p341_p0, %p335_p11 }
  0x20   :  { %345 = shalt.err (!%p342_p1)
}
  0x21   :  { %30 = dma.hbm_to_vmem [thread:$0]  %s461_s1, 128, %s28_s15, [#allocation6]  }
  0x22   :  { %368 = dma.done.wait [#allocation3], 128  }
  0x23   :  { %369 = vsyncadd [#allocation3], 4294967168 }
  0x24   :  { %370 = dma.done.wait [#allocation6], 128  }
  0x25   :  { %371 = vsyncadd [#allocation6], 4294967168  ;;  %v39_v0 = vld [vmem:[#allocation2] sm:$0xff]  ;;  %v40_v1 = vld [vmem:[#allocation5] sm:$0xff]  ;;  %vm44_vm0 = vcmask 523264   ;;  %v376_v6 = vmov 0   ;;  %v60_v7 = vlaneseq }
  0x26   :  { %v41_v2 = vsub.f32 %v39_v0, %v40_v1  ;;  %298 = vset.pattern.permute.xlu0 %v376_v6  ;;  %299 = vset.pattern.permute.xlu1 %v376_v6  ;;  %v377_v11 = vmov 1966171168   ;;  %s378_s9 = smov [#allocation7]   ;;  %vm275_vm3 = vcmask 57344  }
  0x27   :  { %v61_v8 = vshrl.u32 %v60_v7, 7  ;;  %v145_v9 = vand.u32 127, %v60_v7  ;;  %v97_v12 = vunpack.c.l.s4 %v377_v11  ;;  %s283_s10 = sshll.u32 %s378_s9, 4  ;;  %s284_s10 = int_to_ptr.vmem [resolvable:$true] %s283_s10 }
  0x28   :  { %v42_v3 = vadd.f32 1e-06, %v41_v2  ;;  %s350_s11 = scalar_lea.vmem %s284_s10, 32  ;;  %p351_p3 = scmp.lt.s32.totalorder %s284_s10, %s284_s10 }
  0x29   :  { %v423_v10 = vsub.s32 %v145_v9, %v61_v8  ;;  %v98_v13 = vunpack.c.0.s8 %v97_v12  ;;  %v62_v14 = vsub.s32 0, %v61_v8  ;;  %v66_v15 = vsub.s32 1, %v61_v8 }
  0x2a   :  { %v43_v4 = vmul.f32 %v42_v3, %v42_v3  ;;  %v70_v16 = vsub.s32 2, %v61_v8  ;;  %v74_v17 = vsub.s32 3, %v61_v8  ;;  %v78_v18 = vsub.s32 4, %v61_v8 }
  0x2b   :  { %v82_v19 = vsub.s32 5, %v61_v8  ;;  %v86_v20 = vsub.s32 6, %v61_v8  ;;  %v90_v21 = vsub.s32 7, %v61_v8  ;;  %v425_v23 = vsub.s32 %v98_v13, %v61_v8 }
  0x2c   :  { %v45_v5 = vsel %vm44_vm0, %v43_v4, 0.0 }
  0x2d   :  { %46 = vadd.xlane.f32.xlu0 %v45_v5 }
  0xba   :  { %v47_v22 = vpop.xlane.xlu0 %46 }
  0xbb   :  { %300 = vrsqrt.f32 %v47_v22  ;;  %v63_v24 = vrot.slane %v47_v22, %v62_v14  ;;  %v67_v25 = vrot.slane %v47_v22, %v66_v15  ;;  %v71_v26 = vrot.slane %v47_v22, %v70_v16 }
  0xbc   :  { %v75_v27 = vrot.slane %v47_v22, %v74_v17  ;;  %v79_v28 = vrot.slane %v47_v22, %v78_v18  ;;  %v83_v29 = vrot.slane %v47_v22, %v82_v19  ;;  %v87_v30 = vrot.slane %v47_v22, %v86_v20 }
  0xbd   :  { %v91_v31 = vrot.slane %v47_v22, %v90_v21  ;;  %v92_v32 = vcombine.low %v63_v24, %v67_v25  ;;  %vm50_vm1 = vcmp.eq.f32.partialorder %v47_v22, inf  ;;  %v53_v47 = vand.u32 2147483648, %v47_v22 }
  0xbe   :  { %v93_v33 = vcombine.low %v71_v26, %v75_v27  ;;  %v94_v34 = vcombine.low %v79_v28, %v83_v29  ;;  %vm52_vm2 = vcmp.eq.f32.partialorder %v47_v22, 0.0 }
  0xbf   :  { %v95_v35 = vcombine.low %v87_v30, %v91_v31  ;;  %v102_v36 = vrot.slane %v92_v32, %v425_v23 }
  0xc0   :  { %v109_v37 = vrot.slane %v93_v33, %v425_v23  ;;  %v116_v38 = vrot.slane %v94_v34, %v425_v23 }
  0xc1   :  { %v123_v39 = vrot.slane %v95_v35, %v425_v23 }
  0xc2   :  { %v124_v40 = vcombine.low %v102_v36, %v109_v37 }
  0xc3   :  { %v125_v41 = vcombine.low %v116_v38, %v123_v39 }
  0xc4   :  { %v132_v42 = vrot.slane %v124_v40, %v425_v23 }
  0xc5   :  { %v301_v43 = vpop.eup %300  ;;  %v139_v44 = vrot.slane %v125_v41, %v425_v23 }
  0xc6   :  { %v49_v45 = vmul.f32 %v301_v43, %v47_v22 }
  0xc7   :  { %v140_v46 = vcombine.low %v132_v42, %v139_v44 }
  0xc8   :  { %v51_v48 = vsel %vm50_vm1, %v47_v22, %v49_v45 }
  0xc9   :  { %142 = vperm.xlu0 %298, %v140_v46   ;;  %v54_v49 = vsel %vm52_vm2, %v53_v47, %v51_v48 }
  0xca   :  { %v55_v50 = vsub.f32 2.0, %v54_v49 }
  0xcc   :  { %v56_v51 = vmax.f32 %v55_v50, 0.0 }
  0xce   :  { %v167_v52 = vmul.f32 %v56_v51, %v56_v51 }
  0xd0   :  { %v172_v53 = vrot.slane %v167_v52, %v62_v14  ;;  %v176_v54 = vrot.slane %v167_v52, %v66_v15  ;;  %v180_v55 = vrot.slane %v167_v52, %v70_v16  ;;  %v184_v56 = vrot.slane %v167_v52, %v74_v17  ;;  %v57_v14 = vld [vmem:[%s462_s2] sm:$0x1]  ;;  %s346_s2 = scalar_lea.vmem %s284_s10, 16 }
  0xd1   :  { %v188_v57 = vrot.slane %v167_v52, %v78_v18  ;;  %v192_v58 = vrot.slane %v167_v52, %v82_v19  ;;  %v196_v59 = vrot.slane %v167_v52, %v86_v20  ;;  %v200_v60 = vrot.slane %v167_v52, %v90_v21  ;;  %p347_p2 = scmp.ne.s32.totalorder %s284_s10, %s346_s2  ;;  %p352_p4 = scmp.lt.s32.totalorder %s350_s11, %s346_s2 }
  0xd2   :  { %v201_v61 = vcombine.low %v172_v53, %v176_v54  ;;  %v202_v62 = vcombine.low %v180_v55, %v184_v56  ;;  %v58_v16 = vsub.f32 1.0, %v57_v14 }
  0xd3   :  { %v203_v63 = vcombine.low %v188_v57, %v192_v58  ;;  %v204_v0 = vcombine.low %v196_v59, %v200_v60  ;;  %p353_p5 = por %p352_p4, %p351_p3 }
  0xd4   :  { %v211_v1 = vrot.slane %v201_v61, %v425_v23  ;;  %v218_v2 = vrot.slane %v202_v62, %v425_v23 }
  0xd5   :  { %v225_v3 = vrot.slane %v203_v63, %v425_v23  ;;  %v232_v4 = vrot.slane %v204_v0, %v425_v23  ;;  %p354_p6 = pnand %p353_p5, %p347_p2 }
  0xd6   :  { %v233_v5 = vcombine.low %v211_v1, %v218_v2 }
  0xd7   :  { %v234_v6 = vcombine.low %v225_v3, %v232_v4 }
  0xd8   :  { %v241_v7 = vrot.slane %v233_v5, %v425_v23 }
  0xd9   :  { %v248_v8 = vrot.slane %v234_v6, %v425_v23 }
  0xdb   :  { %v249_v9 = vcombine.low %v241_v7, %v248_v8 }
  0xdd   :  { %251 = vperm.xlu1 %299, %v249_v9  }
 0x148   :  { %v143_v11 = vpop.permute.xlu0 %142 }
 0x149   :  { %v149_v12 = vrot.slane %v143_v11, %v423_v10 }
 0x14b   :  { %v156_v13 = vrot.slane %v149_v12, %v425_v23 }
 0x14d   :  { %v163_v17 = vrot.slane %v156_v13, %v425_v23 }
 0x14f   :  { %v165_v20 = vmul.f32 %v163_v17, %v58_v16 }
 0x151   :  { %v166_v24 = vmul.f32 0.5, %v165_v20 }
 0x15c   :  { %v252_v15 = vpop.permute.xlu1 %251 }
 0x15d   :  { %v256_v18 = vrot.slane %v252_v15, %v423_v10 }
 0x15f   :  { %v263_v19 = vrot.slane %v256_v18, %v425_v23 }
 0x161   :  { %v270_v21 = vrot.slane %v263_v19, %v425_v23 }
 0x163   :  { %v272_v22 = vmul.f32 %v270_v21, %v57_v14 }
 0x165   :  { %v273_v25 = vmul.f32 0.5, %v272_v22 }
 0x167   :  { %v274_v26 = vadd.f32 %v273_v25, %v166_v24 }
 0x169   :  { %276 = vst.msk [vmem:[#allocation7] sm:$0x1] %vm275_vm3, %v274_v26 }
 0x16a   :  { %357 = shalt.err (!%p354_p6)
}
 0x16b   :  { %s358_s14 = scalar_lea.hbm %s463_s3, 16 }
 0x16c   :  { %p359_p7 = scmp.ne.s32.totalorder %s463_s3, %s358_s14  ;;  %p362_p8 = scmp.lt.u32.totalorder %s358_s14, %s463_s3 }
 0x16e   :  { %p364_p9 = pnand %p362_p8, %p359_p7 }
 0x170   :  { %367 = shalt.err (!%p364_p9)
}
 0x171   :  { %286 = dma.vmem_to_hbm [thread:$0]  %s284_s10, 16, %s463_s3, [#allocation4]  }
 0x172   :  { %372 = dma.done.wait [#allocation4], 16  }
 0x173   :  { %373 = vsyncadd [#allocation4], 4294967280 }
 0x174   :  { %290 = vsyncpa [#allocation3], 1 }
 0x175   :  { %291 = vsyncpa [#allocation6], 1 }
 0x176   :  { %292 = vsyncpa [#allocation4], 1 }

</bundles_post_ra>
